<compile_context>
chip_gen: v7x
topology: tpu7x:2x2x1
jax: 0.10.0
libtpu: 0.0.40
codegen_flags: <defaults>
</compile_context>

<pallas_src>
import functools

import jax
import jax.numpy as jnp
from jax.experimental import pallas as pl
from jax.experimental.pallas import tpu as pltpu


def _round_up(x: int, m: int) -> int:
    return ((x + m - 1) // m) * m


def hero2vec_kernel(x_ref, w_emb_ref, w_out_ref, b_ref, o_ref):
    # x_ref     : (TB, N, H)  batch tile of input heroes (unpadded hero axis)
    # w_emb_ref : (H, E)      embedding weights, pre-scaled by 1/N
    # w_out_ref : (E, Hp)     output-projection weights (hero axis padded to 128)
    # b_ref     : (1, Hp)     output bias (hero axis padded to 128)
    # o_ref     : (TB, Hp)    logits tile (lane-dense 128-wide stores)
    x = x_ref[...]

    # Mean over the N=4 heroes pushed before the matmul (linearity); the 1/N
    # factor is folded into w_emb_ref, so a plain sublane-axis sum suffices.
    x_sum = jnp.sum(x, axis=1)                                    # (TB, H)

    team = jnp.dot(x_sum, w_emb_ref[...],
                   preferred_element_type=jnp.float32)            # (TB, E)
    logits = jnp.dot(team, w_out_ref[...],
                     preferred_element_type=jnp.float32) + b_ref[...]
    o_ref[...] = logits.astype(o_ref.dtype)


@functools.partial(jax.jit, static_argnames=("block_b", "unpad_output"))
def hero2vec_forward(inputs, w_emb_t, w_out_t, b_out, *,
                     block_b: int = 2048, unpad_output: bool = True):
    B, N, H = inputs.shape
    E = w_emb_t.shape[1]
    assert w_emb_t.shape == (H, E)
    assert w_out_t.shape == (E, H)
    assert b_out.shape == (H,)

    # Only the OUTPUT hero axis is padded 122 -> 128 (lane-dense stores).
    Hp = _round_up(H, 128)
    w_emb = w_emb_t.astype(jnp.float32) / float(N)                 # (H, E), 1/N folded
    w_out_p = jnp.pad(w_out_t.astype(jnp.float32),
                      ((0, 0), (0, Hp - H)))                       # (E, Hp)
    b_p = jnp.pad(b_out.astype(jnp.float32), (0, Hp - H)).reshape(1, Hp)

    # Batch tiling: multiple of 8 sublanes, capped at block_b, and capped at
    # ~ceil(B/2) so the grid has >= 2 blocks (both v7x TensorCores get work).
    half = _round_up(pl.cdiv(B, 2), 8)
    TB = max(8, min(block_b, half))
    grid = (pl.cdiv(B, TB),)   # partial last block handled by Pallas (masked stores)

    out = pl.pallas_call(
        hero2vec_kernel,
        out_shape=jax.ShapeDtypeStruct((B, Hp), jnp.float32),
        grid_spec=pltpu.PrefetchScalarGridSpec(
            num_scalar_prefetch=0,
            grid=grid,
            in_specs=[
                pl.BlockSpec((TB, N, H), lambda i: (i, 0, 0)),     # x tile (pipelined)
                pl.BlockSpec((H, E), lambda i: (0, 0)),            # weights resident
                pl.BlockSpec((E, Hp), lambda i: (0, 0)),
                pl.BlockSpec((1, Hp), lambda i: (0, 0)),
            ],
            out_specs=pl.BlockSpec((TB, Hp), lambda i: (i, 0)),
        ),
        compiler_params=pltpu.CompilerParams(
            dimension_semantics=("parallel",),
            # ~18 MiB live at TB=2048 (2 x 8 MiB x-tile + 2 x 1 MiB out + weights):
            # above v5e's 16 MiB scoped default, well under v7x's 64 MiB physical.
            vmem_limit_bytes=32 << 20,
        ),
    )(inputs, w_emb, w_out_p, b_p)

    if unpad_output:
        out = out[:, :H]       # extra XLA copy; pass unpad_output=False to skip
    return out


def hero2vec_reference(inputs, w_emb_t, w_out_t, b_out):
    embedded = jnp.einsum("bnh,he->bne", inputs, w_emb_t)
    team = jnp.mean(embedded, axis=1)
    return team @ w_out_t + b_out[None, :]


if __name__ == "__main__":
    MAX_HERO_ID = 121
    HERO_COUNT = MAX_HERO_ID + 1     # 122
    INPUT_HEROES = 4
    EMB_DIM = 32                     # small emb_dim for the synthetic run
    BATCH = 4

    key = jax.random.PRNGKey(0)
    k_x, k_we, k_wo, k_b = jax.random.split(key, 4)

    # Inputs: any float vectors over heroes (the PyTorch module applies a
    # Linear over the last dim).  TODO(synk): if real inputs are one-hot hero
    # ids, a 4-row SMEM-indexed gather from the (H,E) table would cut input
    # HBM traffic >100x; kept dense here to preserve the Linear semantics.
    inputs = jax.random.normal(k_x, (BATCH, INPUT_HEROES, HERO_COUNT), jnp.float32)

    # Synthetic parameters (shapes match nn.Linear, stored pre-transposed):
    #   hero_embedding.weight      : (emb_dim, hero_count) -> w_emb_t = W.T
    #   missing_hero_logits.weight : (hero_count, emb_dim) -> w_out_t = W.T
    #   missing_hero_logits.bias   : (hero_count,)
    w_emb_t = 0.02 * jax.random.normal(k_we, (HERO_COUNT, EMB_DIM), jnp.float32)
    w_out_t = 0.02 * jax.random.normal(k_wo, (EMB_DIM, HERO_COUNT), jnp.float32)
    b_out = 0.01 * jax.random.normal(k_b, (HERO_COUNT,), jnp.float32)

    out = hero2vec_forward(inputs, w_emb_t, w_out_t, b_out)
    out = jax.block_until_ready(out)

    ref = hero2vec_reference(inputs, w_emb_t, w_out_t, b_out)
    assert out.shape == (BATCH, HERO_COUNT)
    assert jnp.allclose(out, ref, atol=1e-4, rtol=1e-4)

    print("KERNEL_OK")
</pallas_src>

<mosaic_0001>
module attributes {stable_mosaic.version = 11 : i64} {
  func.func @hero2vec_kernel(%arg0: i32, %arg1: memref<8x4x122xf32, #tpu.memory_space<vmem>>, %arg2: memref<122x32xf32, #tpu.memory_space<vmem>>, %arg3: memref<32x128xf32, #tpu.memory_space<vmem>>, %arg4: memref<1x128xf32, #tpu.memory_space<vmem>>, %arg5: memref<8x128xf32, #tpu.memory_space<vmem>>) attributes {dimension_semantics = [#tpu.dimension_semantics<parallel>], iteration_bounds = array<i64: 1>, scalar_prefetch = 0 : i64, scratch_operands = 0 : i64, tpu.core_type = #tpu.core_type<tc>, window_params = [{transform_indices = @transform_0, window_bounds = array<i64: 8, 4, 122>}, {pipeline_mode = #tpu.pipeline_mode<synchronous>, transform_indices = @transform_1, window_bounds = array<i64: 122, 32>}, {pipeline_mode = #tpu.pipeline_mode<synchronous>, transform_indices = @transform_2, window_bounds = array<i64: 32, 128>}, {pipeline_mode = #tpu.pipeline_mode<synchronous>, transform_indices = @transform_3, window_bounds = array<i64: 1, 128>}, {transform_indices = @transform_4, window_bounds = array<i64: 8, 128>}]} {
    %c0 = arith.constant 0 : index
    %c0_0 = arith.constant 0 : index
    %c0_1 = arith.constant 0 : index
    %0 = vector.load %arg1[%c0, %c0_0, %c0_1] : memref<8x4x122xf32, #tpu.memory_space<vmem>>, vector<8x4x122xf32>
    %cst = arith.constant dense<0.000000e+00> : vector<8x122xf32>
    %1 = vector.multi_reduction <add>, %0, %cst [1] : vector<8x4x122xf32> to vector<8x122xf32>
    %c0_2 = arith.constant 0 : index
    %c0_3 = arith.constant 0 : index
    %2 = vector.load %arg2[%c0_2, %c0_3] : memref<122x32xf32, #tpu.memory_space<vmem>>, vector<122x32xf32>
    %cst_4 = arith.constant dense<0.000000e+00> : vector<8x32xf32>
    %3 = tpu.matmul %1, %2, %cst_4 {dimension_numbers = #tpu.dot_dimension_numbers<[1], [0], [0], [1], [0, 0, 1, 1], [], []>} : vector<8x122xf32>, vector<122x32xf32>, vector<8x32xf32> -> vector<8x32xf32>
    %c0_5 = arith.constant 0 : index
    %c0_6 = arith.constant 0 : index
    %4 = vector.load %arg3[%c0_5, %c0_6] : memref<32x128xf32, #tpu.memory_space<vmem>>, vector<32x128xf32>
    %cst_7 = arith.constant dense<0.000000e+00> : vector<8x128xf32>
    %5 = tpu.matmul %3, %4, %cst_7 {dimension_numbers = #tpu.dot_dimension_numbers<[1], [0], [0], [1], [0, 0, 1, 1], [], []>} : vector<8x32xf32>, vector<32x128xf32>, vector<8x128xf32> -> vector<8x128xf32>
    %c0_8 = arith.constant 0 : index
    %c0_9 = arith.constant 0 : index
    %6 = vector.load %arg4[%c0_8, %c0_9] : memref<1x128xf32, #tpu.memory_space<vmem>>, vector<1x128xf32>
    %7 = vector.broadcast %6 : vector<1x128xf32> to vector<8x128xf32>
    %8 = arith.addf %5, %7 : vector<8x128xf32>
    %c0_10 = arith.constant 0 : index
    %c0_11 = arith.constant 0 : index
    %9 = vector.load %arg5[%c0_10, %c0_11] : memref<8x128xf32, #tpu.memory_space<vmem>>, vector<8x128xf32>
    tpu.vector_store %arg5[%c0_10, %c0_11], %8 {strides = array<i32>} : memref<8x128xf32, #tpu.memory_space<vmem>>, vector<8x128xf32>,
    return
  }
  func.func @transform_0(%arg0: i32) -> (i32, i32, i32) {
    %c0_i32 = arith.constant 0 : i32
    %c0_i32_0 = arith.constant 0 : i32
    %c0_i32_1 = arith.constant 0 : i32
    return %arg0, %c0_i32, %c0_i32_0 : i32, i32, i32
  }
  func.func @transform_1(%arg0: i32) -> (i32, i32) {
    %c0_i32 = arith.constant 0 : i32
    %c0_i32_0 = arith.constant 0 : i32
    %c0_i32_1 = arith.constant 0 : i32
    return %c0_i32, %c0_i32_0 : i32, i32
  }
  func.func @transform_2(%arg0: i32) -> (i32, i32) {
    %c0_i32 = arith.constant 0 : i32
    %c0_i32_0 = arith.constant 0 : i32
    %c0_i32_1 = arith.constant 0 : i32
    return %c0_i32, %c0_i32_0 : i32, i32
  }
  func.func @transform_3(%arg0: i32) -> (i32, i32) {
    %c0_i32 = arith.constant 0 : i32
    %c0_i32_0 = arith.constant 0 : i32
    %c0_i32_1 = arith.constant 0 : i32
    return %c0_i32, %c0_i32_0 : i32, i32
  }
  func.func @transform_4(%arg0: i32) -> (i32, i32) {
    %c0_i32 = arith.constant 0 : i32
    %c0_i32_0 = arith.constant 0 : i32
    return %arg0, %c0_i32 : i32, i32
  }
}

</mosaic_0001>

<bundles_post_ra>
// kernel: hero2vec_forward.1
= control target key start
LH: loop header
LB: loop body
LE: loop exit
PB: predicated region body
PF: predicated region fallthrough
CT: control target
= control target key end

     0   :  { %9 = vsyncpa [#allocation3], 0  ;;  %v434_v2 = vmov 0.0|0.0   ;;  %vm435_vm0 = vmmov 0   ;;  %v436_v6 = vmov 0.0   ;;  %vm26_vm1 = vcmask 994304   ;;  %s602_s0 = inlined_call_operand.vmem [shape: f32[4,4,122], index: 0, kind: input, shape index: {}]   ;;  %s603_s1 = inlined_call_operand.vmem [shape: f32[122,32], index: 1, kind: input, shape index: {}]   ;;  %s604_s2 = inlined_call_operand.vmem [shape: f32[32,128], index: 2, kind: input, shape index: {}]   ;;  %s605_s3 = inlined_call_operand.vmem [shape: f32[1,128], index: 3, kind: input, shape index: {}]   ;;  %s606_s4 = inlined_call_operand.hbm [shape: f32[4,128], index: 4, kind: output, shape index: {}]  }
   0x1   :  { %v83_v0 = vld [vmem:[%s603_s1] sm:$0xff]  ;;  %v84_v1 = vld [vmem:[%s603_s1 + $0x8] sm:$0xff]  ;;  %372 = vmatprep.subr.bf16.mxu0 %v434_v2  ;;  %v85_v4 = vld [vmem:[%s603_s1 + $0x10] sm:$0xff]  ;;  %397 = vmatprep.subr.bf16.mxu1 %v434_v2  ;;  %vm107_vm2 = vcmask 1041409   ;;  %vm109_vm3 = vcmask 1042434   ;;  %vm111_vm4 = vcmask 1043459  }
   0x2   :  { %v373_v3 = vpack.c.bf16 %v84_v1, %v83_v0  ;;  %v86_v5 = vld [vmem:[%s603_s1 + $0x18] sm:$0xff]  ;;  %358 = vmatprep.mubr.msk.f32.mxu0 %vm435_vm0, %v436_v6  ;;  %369 = vmatprep.mubr.msk.f32.mxu1 %vm435_vm0, %v436_v6  ;;  %v87_v8 = vld [vmem:[%s603_s1 + $0x20] sm:$0xff]  ;;  %v88_v9 = vld [vmem:[%s603_s1 + $0x28] sm:$0xff]  ;;  %vm113_vm5 = vcmask 1044484   ;;  %vm115_vm6 = vcmask 1045509   ;;  %vm124_vm7 = vcmask 1041408  }
   0x3   :  { %v376_v7 = vpack.c.bf16 %v86_v5, %v85_v4  ;;  %v89_v10 = vld [vmem:[%s603_s1 + $0x30] sm:$0xff]  ;;  %v90_v11 = vld [vmem:[%s603_s1 + $0x38] sm:$0xff]  ;;  %v496_v12 = vld [vmem:[%s603_s1 + $0x40] sm:$0xff]  ;;  %v379_v19 = vpack.c.bf16 %v88_v9, %v87_v8  ;;  %vm117_vm8 = vcmask 1046534   ;;  %vm437_vm9 = vmmov 1  }
   0x4   :  { %374 = vmatpush3.bf16.msra.mxu0 %v373_v3  ;;  %v501_v13 = vld [vmem:[%s603_s1 + $0x48] sm:$0xff]  ;;  %v506_v14 = vld [vmem:[%s603_s1 + $0x50] sm:$0xff]  ;;  %v511_v15 = vld [vmem:[%s603_s1 + $0x58] sm:$0xff]  ;;  %v382_v20 = vpack.c.bf16 %v90_v11, %v89_v10  ;;  %vm119_vm11 = vcmask 1047559   ;;  %vm121_vm12 = vcmask 998400   ;;  %vm209_vm13 = vcmask 261120  }
   0x5   :  { %375 = vmatprep.subr.bf16.mxu0 %v434_v2  ;;  %v18_v16 = vld [vmem:[%s602_s0] sm:$0xf]  ;;  %v19_v17 = vld [vmem:[%s602_s0 + $0x4] sm:$0xf]  ;;  %v20_v18 = vld [vmem:[%s602_s0 + $0x8] sm:$0xf]  ;;  %v385_v24 = vpack.c.bf16 %v501_v13, %v496_v12  ;;  %v388_v25 = vpack.c.bf16 %v511_v15, %v506_v14 }
   0x6   :  { %v21_v21 = vld [vmem:[%s602_s0 + $0xc] sm:$0xf]  ;;  %v22_v22 = vld [vmem:[%s602_s0 + $0x10] sm:$0xf]  ;;  %v23_v23 = vld [vmem:[%s602_s0 + $0x14] sm:$0xf] }
   0x7   :  { %v24_v26 = vld [vmem:[%s602_s0 + $0x18] sm:$0xf]  ;;  %v27_v27 = vsel %vm26_vm1, %v18_v16, 0.0  ;;  %v34_v28 = vsel %vm26_vm1, %v19_v17, 0.0  ;;  %v25_v29 = vld [vmem:[%s602_s0 + $0x1c] sm:$0xf]  ;;  %vm395_vm10 = vmpackc.low %vm124_vm7, %vm437_vm9 }
   0x8   :  { %377 = vmatpush3.bf16.msra.mxu0 %v376_v7  ;;  %v28_v30 = vrot.slane %v27_v27, 4  ;;  %v35_v31 = vrot.slane %v34_v28, 4  ;;  %v41_v32 = vsel %vm26_vm1, %v20_v18, 0.0  ;;  %v48_v33 = vsel %vm26_vm1, %v21_v21, 0.0  ;;  %v198_v7 = vld [vmem:[%s604_s2] sm:$0xff]  ;;  %v199_v8 = vld [vmem:[%s604_s2 + $0x8] sm:$0xff] }
   0x9   :  { %378 = vmatprep.subr.bf16.mxu0 %v434_v2  ;;  %v42_v34 = vrot.slane %v41_v32, 4  ;;  %v49_v35 = vrot.slane %v48_v33, 4  ;;  %v55_v36 = vsel %vm26_vm1, %v22_v22, 0.0  ;;  %v62_v37 = vsel %vm26_vm1, %v23_v23, 0.0  ;;  %v95_v9 = vld [vmem:[%s603_s1 + $0x60] sm:$0xff]  ;;  %v96_v16 = vld [vmem:[%s603_s1 + $0x68] sm:$0xff] }
   0xa   :  { %v29_v38 = vadd.f32 %v28_v30, %v27_v27  ;;  %v36_v39 = vadd.f32 %v35_v31, %v34_v28  ;;  %v56_v40 = vrot.slane %v55_v36, 4  ;;  %v63_v41 = vrot.slane %v62_v37, 4  ;;  %v200_v21 = vld [vmem:[%s604_s2 + $0x10] sm:$0xff]  ;;  %v201_v22 = vld [vmem:[%s604_s2 + $0x18] sm:$0xff] }
   0xb   :  { %v43_v42 = vadd.f32 %v42_v34, %v41_v32  ;;  %v50_v43 = vadd.f32 %v49_v35, %v48_v33  ;;  %v69_v44 = vsel %vm26_vm1, %v24_v26, 0.0  ;;  %v76_v45 = vsel %vm26_vm1, %v25_v29, 0.0  ;;  %v97_v34 = vld [vmem:[%s603_s1 + $0x70] sm:$0xff]  ;;  %v98_v35 = vld [vmem:[%s603_s1 + $0x78] sm:$0x3] }
   0xc   :  { %380 = vmatpush3.bf16.msra.mxu0 %v379_v19  ;;  %v30_v46 = vrot.slane %v29_v38, 2  ;;  %v37_v47 = vrot.slane %v36_v39, 2  ;;  %v57_v48 = vadd.f32 %v56_v40, %v55_v36  ;;  %v64_v49 = vadd.f32 %v63_v41, %v62_v37 }
   0xd   :  { %381 = vmatprep.subr.bf16.mxu0 %v434_v2  ;;  %v44_v50 = vrot.slane %v43_v42, 2  ;;  %v51_v51 = vrot.slane %v50_v43, 2  ;;  %v70_v52 = vrot.slane %v69_v44, 4  ;;  %v77_v53 = vrot.slane %v76_v45, 4 }
   0xe   :  { %v31_v54 = vadd.f32 %v30_v46, %v29_v38  ;;  %v38_v55 = vadd.f32 %v37_v47, %v36_v39  ;;  %v58_v56 = vrot.slane %v57_v48, 2  ;;  %v65_v57 = vrot.slane %v64_v49, 2 }
   0xf   :  { %v45_v58 = vadd.f32 %v44_v50, %v43_v42  ;;  %v52_v59 = vadd.f32 %v51_v51, %v50_v43  ;;  %v71_v60 = vadd.f32 %v70_v52, %v69_v44  ;;  %v78_v61 = vadd.f32 %v77_v53, %v76_v45  ;;  %v302_v42 = vld [vmem:[%s605_s3] ss:$0 sm:$0xff] }
  0x10   :  { %383 = vmatpush3.bf16.msra.mxu0 %v382_v20  ;;  %v32_v62 = vrot.slane %v31_v54, 1  ;;  %v39_v63 = vrot.slane %v38_v55, 1  ;;  %v59_v0 = vadd.f32 %v58_v56, %v57_v48  ;;  %v66_v1 = vadd.f32 %v65_v57, %v64_v49 }
  0x11   :  { %384 = vmatprep.subr.bf16.mxu0 %v434_v2  ;;  %v46_v3 = vrot.slane %v45_v58, 1  ;;  %v53_v4 = vrot.slane %v52_v59, 1  ;;  %v72_v5 = vrot.slane %v71_v60, 2  ;;  %v79_v6 = vrot.slane %v78_v61, 2 }
  0x12   :  { %v33_v10 = vadd.f32 %v32_v62, %v31_v54  ;;  %v40_v11 = vadd.f32 %v39_v63, %v38_v55  ;;  %v60_v12 = vrot.slane %v59_v0, 1  ;;  %v67_v13 = vrot.slane %v66_v1, 1 }
  0x13   :  { %v47_v17 = vadd.f32 %v46_v3, %v45_v58  ;;  %v54_v18 = vadd.f32 %v53_v4, %v52_v59  ;;  %v73_v19 = vadd.f32 %v72_v5, %v71_v60  ;;  %v80_v20 = vadd.f32 %v79_v6, %v78_v61 }
  0x14   :  { %386 = vmatpush3.bf16.msra.mxu0 %v385_v24  ;;  %v61_v23 = vadd.f32 %v60_v12, %v59_v0  ;;  %v68_v24 = vadd.f32 %v67_v13, %v66_v1  ;;  %v108_v26 = vsel %vm107_vm2, %v40_v11, %v33_v10  ;;  %v398_v27 = vpack.c.bf16 %v199_v8, %v198_v7 }
  0x15   :  { %387 = vmatprep.subr.bf16.mxu0 %v434_v2  ;;  %v74_v28 = vrot.slane %v73_v19, 1  ;;  %v110_v29 = vsel %vm109_vm3, %v47_v17, %v108_v26  ;;  %v391_v30 = vpack.c.bf16 %v96_v16, %v95_v9  ;;  %v81_v31 = vrot.slane %v80_v20, 1 }
  0x16   :  { %v112_v32 = vsel %vm111_vm4, %v54_v18, %v110_v29  ;;  %399 = vmatpush3.bf16.msra.mxu1 %v398_v27  ;;  %v401_v33 = vpack.c.bf16 %v201_v22, %v200_v21 }
  0x17   :  { %v75_v36 = vadd.f32 %v74_v28, %v73_v19  ;;  %v114_v14 = vsel %vm113_vm5, %v61_v23, %v112_v32  ;;  %400 = vmatprep.subr.bf16.mxu1 %v434_v2  ;;  %v82_v37 = vadd.f32 %v81_v31, %v80_v20 }
  0x18   :  { %389 = vmatpush3.bf16.msra.mxu0 %v388_v25  ;;  %v116_v15 = vsel %vm115_vm6, %v68_v24, %v114_v14  ;;  %v394_v25 = vpack.c.bf16 %v98_v35, %v97_v34 }
  0x19   :  { %390 = vmatprep.subr.bf16.mxu0 %v434_v2  ;;  %v118_v38 = vsel %vm117_vm8, %v75_v36, %v116_v15 }
  0x1a   :  { %402 = vmatpush3.bf16.msra.mxu1 %v401_v33  ;;  %v120_v39 = vsel %vm119_vm11, %v82_v37, %v118_v38 }
  0x1c   :  { %392 = vmatpush3.bf16.msra.mxu0 %v391_v30 }
  0x1d   :  { %393 = vmatprep.subr.bf16.mxu0 %v434_v2 }
  0x20   :  { %396 = vmatpush3.bf16.msk.msra.mxu0 %vm395_vm10, %v394_v25 }
  0x23   :  { %359 = vmatmul.mubr.msk.f32.vlgmr.msra.gmra.mrb[0].mxu0 %vm121_vm12, %v120_v39 }
  0xf6   :  { %v194_v40 = vpop.f32.mrb[0].mxu0 }
  0xf7   :  { %v360_v41 = vpop.f32.mrb[1].mxu0  ;;  %370 = vmatmul.mubr.msk.f32.vlgmr.msra.gmra.mrb[0].mxu1 %vm209_vm13, %v194_v40 }
 0x1ca   :  { %v279_v43 = vpop.f32.mrb[0].mxu1 }
 0x1cb   :  { %v280_v44 = vadd.f32 %v302_v42, %v279_v43  ;;  %v371_v45 = vpop.f32.mrb[1].mxu1 }
 0x1cd   :  { %283 = vst [vmem:[#allocation2] sm:$0xff] %v280_v44 }
 0x1ce   :  { %288 = vsyncadd [#allocation3], 64  ;;  %s438_s18 = smov [#allocation2]  }
 0x1cf   :  { %s289_s19 = sshll.u32 %s438_s18, 4  ;;  %s290_s19 = int_to_ptr.vmem [resolvable:$true] %s289_s19 }
 0x1d0   :  { %s410_s20 = scalar_lea.vmem %s290_s19, 64  ;;  %s414_s21 = scalar_lea.vmem %s290_s19, 128 }
 0x1d1   :  { %p411_p0 = scmp.ne.s32.totalorder %s290_s19, %s410_s20  ;;  %p415_p1 = scmp.lt.s32.totalorder %s290_s19, %s290_s19 }
 0x1d2   :  { %p416_p2 = scmp.lt.s32.totalorder %s414_s21, %s410_s20 }
 0x1d4   :  { %p417_p3 = por %p416_p2, %p415_p1 }
 0x1d6   :  { %p418_p4 = pnand %p417_p3, %p411_p0 }
 0x1d8   :  { %421 = shalt.err (!%p418_p4)
}
 0x1d9   :  { %s422_s3 = scalar_lea.hbm %s606_s4, 64 }
 0x1da   :  { %p423_p5 = scmp.ne.s32.totalorder %s606_s4, %s422_s3  ;;  %p426_p6 = scmp.lt.u32.totalorder %s422_s3, %s606_s4 }
 0x1dc   :  { %p428_p7 = pnand %p426_p6, %p423_p5 }
 0x1de   :  { %431 = shalt.err (!%p428_p7)
}
 0x1df   :  { %s439_s28 = smov 64   ;;  %s440_s0 = smov 4  }
 0x1e0   :  { %295 = dma.vmem_to_hbm [thread:$0]  %s290_s19, 64, %s606_s4, [#allocation3], %s439_s28, %s439_s28, %s440_s0  }
 0x1e1   :  { %432 = dma.done.wait [#allocation3], 128  }
 0x1e2   :  { %433 = vsyncadd [#allocation3], 4294967168 }
 0x1e3   :  { %299 = vsyncpa [#allocation3], 1 }

</bundles_post_ra>
